<compile_context>
chip_gen: v6e
topology: v6e:2x2x1
jax: 0.10.0
libtpu: 0.0.40
codegen_flags: <defaults>
</compile_context>

<pallas_src>
import jax
import jax.numpy as jnp
from jax.experimental import pallas as pl
from jax.experimental.pallas import tpu as pltpu

_MIB = 1024 * 1024
# Below this total-x size, don't split the batch just for megacore: the
# ~0.35 us per-grid-step overhead outweighs the benefit.
_MEGACORE_SPLIT_MIN_BYTES = 4 * _MIB


def _round_up(v, m):
    return ((v + m - 1) // m) * m


def _cdiv(a, b):
    return -(-a // b)


def _make_kernel(*, td, d_total, need_col_mask):
    def kernel(x_ref, w_ref, b_ref, o_ref, acc_ref):
        # x_ref: (tb, td) VMEM; w_ref: (1, td) VMEM (resident across batch axis);
        # b_ref: (1, 1) SMEM; o_ref: (1, tb) VMEM (lane-dense, resident across
        # the D axis); acc_ref: (1, tb) f32 VMEM scratch.
        j = pl.program_id(1)

        @pl.when(j == 0)
        def _init():
            acc_ref[...] = jnp.zeros_like(acc_ref)

        prod = x_ref[...].astype(jnp.float32) * w_ref[...].astype(jnp.float32)
        if need_col_mask:
            # Partial last D block: zero the out-of-range columns (garbage in
            # both x and w OOB lanes); select-after-multiply is NaN/Inf safe.
            col = j * td + jax.lax.broadcasted_iota(jnp.int32, prod.shape, 1)
            prod = jnp.where(col < d_total, prod, 0.0)
        acc_ref[...] += jnp.sum(prod, axis=-1)[None, :]

        @pl.when(j == pl.num_programs(1) - 1)
        def _finalize():
            o_ref[...] = (acc_ref[...] + b_ref[0, 0]).astype(o_ref.dtype)

    return kernel


def linear_reg_forward(x, weight, bias, *, max_x_tile_bytes=None):
    """y = x @ weight.T + bias (torch.nn.Linear with out_features == 1).

    x: (B, D); weight: (1, D) (torch layout); bias: (1,).
    """
    B, D = x.shape
    itemsize = jnp.dtype(x.dtype).itemsize
    row_bytes = D * itemsize
    x_bytes = B * row_bytes

    # --- per-generation VMEM sizing ---------------------------------------
    try:
        vmem_cap = int(pltpu.get_tpu_info().vmem_capacity_bytes)
    except Exception:  # conservative fallback: v7x per-TC VMEM
        vmem_cap = 64 * _MIB
    if max_x_tile_bytes is None:
        tile_budget = max(4 * _MIB, vmem_cap // 5)     # per x buffer (2x buffered)
    else:
        tile_budget = int(max_x_tile_bytes)            # test/override hook
    vmem_limit = int(max(32 * _MIB, min(vmem_cap * 3 // 4, vmem_cap - 8 * _MIB)))

    # --- tiling ------------------------------------------------------------
    if 128 * row_bytes <= tile_budget:
        # Whole feature dim per block (block dim == full array dim: no 128
        # alignment needed for D, no padding of x).
        td, nd, need_mask = D, 1, False
        tb_cap = (tile_budget // row_bytes) // 128 * 128          # >= 128 here
        if B * row_bytes <= tile_budget and (B < 256 or x_bytes <= _MEGACORE_SPLIT_MIN_BYTES):
            tb = B                                                # single batch tile
        else:
            # >= 2 batch tiles, multiple of 128 lanes (unmasked output stores;
            # lets the "parallel" axis feed both TensorCores on v7x).
            tb = min(tb_cap, max(128, _round_up(_cdiv(B, 2), 128)))
    else:
        # Wide-feature guard: stream D over a trailing "arbitrary" reduction
        # axis with a resident f32 accumulator (prevents VMEM OOM for huge D).
        tb = B if B <= 128 else 128
        td = max(128, (tile_budget // (tb * itemsize)) // 128 * 128)
        td = min(td, _round_up(D, 128))
        nd = _cdiv(D, td)
        need_mask = (D % td) != 0

    nb = _cdiv(B, tb)
    grid = (nb, nd)

    kernel = _make_kernel(td=td, d_total=D, need_col_mask=need_mask)

    out = pl.pallas_call(
        kernel,
        out_shape=jax.ShapeDtypeStruct((1, B), x.dtype),
        grid_spec=pltpu.PrefetchScalarGridSpec(
            num_scalar_prefetch=0,
            grid=grid,
            in_specs=[
                # x tiles stream through VMEM, double-buffered by BlockSpec.
                pl.BlockSpec((tb, td), lambda i, j: (i, j)),
                # weight row: resident across the batch axis.
                pl.BlockSpec((1, td), lambda i, j: (0, j)),
                # bias: scalar in SMEM, essentially free.
                pl.BlockSpec((1, 1), lambda i, j: (0, 0),
                             memory_space=pltpu.MemorySpace.SMEM),
            ],
            # lane-dense (1, tb) row per batch tile; reshaped to (B, 1) below.
            out_specs=pl.BlockSpec((1, tb), lambda i, j: (0, i)),
            scratch_shapes=[pltpu.VMEM((1, tb), jnp.float32)],
        ),
        compiler_params=pltpu.CompilerParams(
            dimension_semantics=("parallel", "arbitrary"),
            vmem_limit_bytes=vmem_limit),
        cost_estimate=pl.CostEstimate(
            flops=2 * B * D,
            transcendentals=0,
            bytes_accessed=(B * D + D + B + 1) * itemsize),
    )(x, weight.reshape(1, D), bias.reshape(1, 1))

    return out.reshape(B, 1)


def _ref(x, weight, bias):
    # Pure-VPU reference (avoids MXU default-precision noise in the check).
    return (x * weight.reshape(1, -1)).sum(axis=-1, keepdims=True) + bias.reshape(1, 1)


if __name__ == "__main__":
    key = jax.random.PRNGKey(0)
    kx, kw, kb, kx2, kx3 = jax.random.split(key, 5)

    # --- main small case (matches the module: Linear(input_dim, 1)) --------
    batch, input_dim = 8, 32
    bound = 1.0 / jnp.sqrt(jnp.float32(input_dim))
    weight = jax.random.uniform(kw, (1, input_dim), jnp.float32, -bound, bound)
    bias = jax.random.uniform(kb, (1,), jnp.float32, -bound, bound)
    x = jax.random.normal(kx, (batch, input_dim), jnp.float32)

    y = linear_reg_forward(x, weight, bias)
    jax.block_until_ready(y)
    assert y.shape == (batch, 1)
    assert jnp.allclose(y, _ref(x, weight, bias), atol=1e-5, rtol=1e-5)

    # --- unaligned B with partial batch tiles (no padded copy of x) --------
    B2, D2 = 300, 50
    b2w = jax.random.uniform(kw, (1, D2), jnp.float32, -0.1, 0.1)
    b2b = jax.random.uniform(kb, (1,), jnp.float32, -0.1, 0.1)
    x2 = jax.random.normal(kx2, (B2, D2), jnp.float32)
    y2 = linear_reg_forward(x2, b2w, b2b, max_x_tile_bytes=32 * 1024)
    assert y2.shape == (B2, 1)
    assert jnp.allclose(y2, _ref(x2, b2w, b2b), atol=1e-5, rtol=1e-5)

    # --- wide-D fallback: streamed reduction axis + masked partial D block -
    B3, D3 = 16, 1000
    b3w = jax.random.uniform(kw, (1, D3), jnp.float32, -0.03, 0.03)
    b3b = jax.random.uniform(kb, (1,), jnp.float32, -0.03, 0.03)
    x3 = jax.random.normal(kx3, (B3, D3), jnp.float32)
    y3 = linear_reg_forward(x3, b3w, b3b, max_x_tile_bytes=16 * 1024)
    assert y3.shape == (B3, 1)
    assert jnp.allclose(y3, _ref(x3, b3w, b3b), atol=2e-5, rtol=2e-5)

    print("KERNEL_OK")
</pallas_src>

<mosaic_0001>
module attributes {stable_mosaic.version = 11 : i64} {
  func.func @kernel(%arg0: i32, %arg1: i32, %arg2: memref<8x32xf32, #tpu.memory_space<vmem>>, %arg3: memref<1x32xf32, #tpu.memory_space<vmem>>, %arg4: memref<1x1xf32, #tpu.memory_space<smem>>, %arg5: memref<1x8xf32, #tpu.memory_space<vmem>>, %arg6: memref<1x8xf32, #tpu.memory_space<vmem>>) attributes {dimension_semantics = [#tpu.dimension_semantics<parallel>, #tpu.dimension_semantics<arbitrary>], iteration_bounds = array<i64: 1, 1>, scalar_prefetch = 0 : i64, scratch_operands = 1 : i64, tpu.core_type = #tpu.core_type<tc>, window_params = [{transform_indices = @transform_0, window_bounds = array<i64: 8, 32>}, {transform_indices = @transform_1, window_bounds = array<i64: 1, 32>}, {transform_indices = @transform_2, window_bounds = array<i64: 1, 1>}, {transform_indices = @transform_3, window_bounds = array<i64: 1, 8>}]} {
    %c0_i32 = arith.constant 0 : i32
    %0 = arith.cmpi eq, %arg1, %c0_i32 : i32
    %1 = arith.extui %0 : i1 to i32
    %c0_i32_0 = arith.constant 0 : i32
    %2 = arith.cmpi ne, %1, %c0_i32_0 : i32
    scf.if %2 {
      %cst_10 = arith.constant 0.000000e+00 : f32
      %15 = vector.broadcast %cst_10 : f32 to vector<1x8xf32>
      %c0_11 = arith.constant 0 : index
      %c0_12 = arith.constant 0 : index
      %16 = vector.load %arg6[%c0_11, %c0_12] : memref<1x8xf32, #tpu.memory_space<vmem>>, vector<1x8xf32>
      tpu.vector_store %arg6[%c0_11, %c0_12], %15 {strides = array<i32>} : memref<1x8xf32, #tpu.memory_space<vmem>>, vector<1x8xf32>,
    } else {
    }
    %c0 = arith.constant 0 : index
    %c0_1 = arith.constant 0 : index
    %3 = vector.load %arg2[%c0, %c0_1] : memref<8x32xf32, #tpu.memory_space<vmem>>, vector<8x32xf32>
    %c0_2 = arith.constant 0 : index
    %c0_3 = arith.constant 0 : index
    %4 = vector.load %arg3[%c0_2, %c0_3] : memref<1x32xf32, #tpu.memory_space<vmem>>, vector<1x32xf32>
    %5 = vector.broadcast %4 : vector<1x32xf32> to vector<8x32xf32>
    %6 = arith.mulf %3, %5 : vector<8x32xf32>
    %c0_4 = arith.constant 0 : index
    %c0_5 = arith.constant 0 : index
    %7 = vector.load %arg6[%c0_4, %c0_5] : memref<1x8xf32, #tpu.memory_space<vmem>>, vector<1x8xf32>
    %cst = arith.constant dense<0.000000e+00> : vector<8xf32>
    %8 = vector.multi_reduction <add>, %6, %cst [1] : vector<8x32xf32> to vector<8xf32>
    %9 = vector.shape_cast %8 : vector<8xf32> to vector<1x8xf32>
    %10 = arith.addf %7, %9 : vector<1x8xf32>
    %c0_6 = arith.constant 0 : index
    %c0_7 = arith.constant 0 : index
    %11 = vector.load %arg6[%c0_6, %c0_7] : memref<1x8xf32, #tpu.memory_space<vmem>>, vector<1x8xf32>
    tpu.vector_store %arg6[%c0_6, %c0_7], %10 {strides = array<i32>} : memref<1x8xf32, #tpu.memory_space<vmem>>, vector<1x8xf32>,
    %c0_i32_8 = arith.constant 0 : i32
    %12 = arith.cmpi eq, %arg1, %c0_i32_8 : i32
    %13 = arith.extui %12 : i1 to i32
    %c0_i32_9 = arith.constant 0 : i32
    %14 = arith.cmpi ne, %13, %c0_i32_9 : i32
    scf.if %14 {
      %c0_10 = arith.constant 0 : index
      %c0_11 = arith.constant 0 : index
      %15 = vector.load %arg6[%c0_10, %c0_11] : memref<1x8xf32, #tpu.memory_space<vmem>>, vector<1x8xf32>
      %c0_12 = arith.constant 0 : index
      %c0_13 = arith.constant 0 : index
      %16 = memref.load %arg4[%c0_12, %c0_13] : memref<1x1xf32, #tpu.memory_space<smem>>
      %17 = vector.broadcast %16 : f32 to vector<1x8xf32>
      %18 = arith.addf %15, %17 : vector<1x8xf32>
      %c0_14 = arith.constant 0 : index
      %c0_15 = arith.constant 0 : index
      %19 = vector.load %arg5[%c0_14, %c0_15] : memref<1x8xf32, #tpu.memory_space<vmem>>, vector<1x8xf32>
      tpu.vector_store %arg5[%c0_14, %c0_15], %18 {strides = array<i32>} : memref<1x8xf32, #tpu.memory_space<vmem>>, vector<1x8xf32>,
    } else {
    }
    return
  }
  func.func @transform_0(%arg0: i32, %arg1: i32) -> (i32, i32) {
    %c0_i32 = arith.constant 0 : i32
    return %arg0, %arg1 : i32, i32
  }
  func.func @transform_1(%arg0: i32, %arg1: i32) -> (i32, i32) {
    %c0_i32 = arith.constant 0 : i32
    %c0_i32_0 = arith.constant 0 : i32
    return %c0_i32, %arg1 : i32, i32
  }
  func.func @transform_2(%arg0: i32, %arg1: i32) -> (i32, i32) {
    %c0_i32 = arith.constant 0 : i32
    %c0_i32_0 = arith.constant 0 : i32
    %c0_i32_1 = arith.constant 0 : i32
    return %c0_i32, %c0_i32_0 : i32, i32
  }
  func.func @transform_3(%arg0: i32, %arg1: i32) -> (i32, i32) {
    %c0_i32 = arith.constant 0 : i32
    %c0_i32_0 = arith.constant 0 : i32
    return %c0_i32, %arg0 : i32, i32
  }
}

</mosaic_0001>

<bundles_post_ra>
// kernel: tpu_custom_call.1
= control target key start
LH: loop header
LB: loop body
LE: loop exit
PB: predicated region body
PF: predicated region fallthrough
CT: control target
= control target key end

     0   :  { %9 = vsyncpa [#allocation5], 0  ;;  %s271_s0 = inlined_call_operand.hbm [shape: f32[8,32], index: 0, kind: input, shape index: {}]   ;;  %s272_s1 = inlined_call_operand.vmem [shape: f32[1,32], index: 1, kind: input, shape index: {}]   ;;  %s273_s2 = inlined_call_operand.<no memory space> [shape: f32[1,1], index: 2, kind: input, shape index: {}]   ;;  %s274_s3 = inlined_call_operand.hbm [shape: f32[1,8], index: 3, kind: output, shape index: {}]  }
   0x1   :  { %10 = vsyncpa [#allocation6], 0  ;;  %s231_s12 = smov [#allocation4]  }
   0x2   :  { %s17_s13 = sshll.u32 %s231_s12, 4  ;;  %s18_s13 = int_to_ptr.vmem [resolvable:$true] %s17_s13 }
   0x3   :  { %s195_s14 = scalar_lea.vmem %s18_s13, 128  ;;  %p200_p1 = scmp.lt.s32.totalorder %s18_s13, %s18_s13 }
   0x4   :  { %p196_p0 = scmp.ne.s32.totalorder %s18_s13, %s195_s14  ;;  %p201_p2 = scmp.lt.s32.totalorder %s195_s14, %s195_s14 }
   0x6   :  { %p202_p3 = por %p201_p2, %p200_p1 }
   0x8   :  { %p203_p4 = pnand %p202_p3, %p196_p0 }
   0xa   :  { %206 = shalt.err (!%p203_p4)
}
   0xb   :  { %20 = dma.hbm_to_vmem [thread:$0]  %s271_s0, 128, %s18_s13, [#allocation5]  }
   0xc   :  { %227 = dma.done.wait [#allocation5], 128  }
   0xd   :  { %228 = vsyncadd [#allocation5], 4294967168  ;;  %v34_v0 = vld [vmem:[#allocation4] sm:$0xff]  ;;  %v180_v1 = vld [vmem:[%s272_s1] ss:$0 sm:$0xff]  ;;  %vm44_vm0 = vcmask 261120   ;;  %v49_v5 = vlaneseq  ;;  %v162_v50 = vstv %s273_s2 }
   0xe   :  { %v42_v2 = vmul.f32 %v180_v1, %v34_v0  ;;  %v232_v4 = vmov 0   ;;  %v233_v9 = vmov 1966171168   ;;  %vm32_vm1 = vcmask 57344   ;;  %s235_s19 = smov [#allocation7]  }
   0xf   :  { %186 = vset.pattern.permute.xlu0 %v232_v4  ;;  %v50_v6 = vshrl.u32 %v49_v5, 7  ;;  %v134_v7 = vand.u32 127, %v49_v5  ;;  %v86_v10 = vunpack.c.l.s4 %v233_v9  ;;  %v234_v40 = vmov 0.0   ;;  %s171_s20 = sshll.u32 %s235_s19, 4  ;;  %s172_s20 = int_to_ptr.vmem [resolvable:$true] %s171_s20 }
  0x10   :  { %v45_v3 = vsel %vm44_vm0, %v42_v2, 0.0  ;;  %33 = vst.msk [vmem:[#allocation2] sm:$0x1] %vm32_vm1, %v234_v40  ;;  %s207_s21 = scalar_lea.vmem %s172_s20, 16  ;;  %s211_s22 = scalar_lea.vmem %s172_s20, 32 }
  0x11   :  { %46 = vadd.xlane.f32.xlu0 %v45_v3  ;;  %v137_v8 = vsub.s32 %v134_v7, %v50_v6  ;;  %v87_v11 = vunpack.c.0.s8 %v86_v10  ;;  %v51_v12 = vsub.s32 0, %v50_v6  ;;  %v55_v13 = vsub.s32 1, %v50_v6  ;;  %p208_p5 = scmp.ne.s32.totalorder %s172_s20, %s207_s21  ;;  %p212_p6 = scmp.lt.s32.totalorder %s172_s20, %s172_s20 }
  0x12   :  { %v59_v14 = vsub.s32 2, %v50_v6  ;;  %v63_v15 = vsub.s32 3, %v50_v6  ;;  %v67_v16 = vsub.s32 4, %v50_v6  ;;  %v71_v17 = vsub.s32 5, %v50_v6  ;;  %p213_p7 = scmp.lt.s32.totalorder %s211_s22, %s207_s21 }
  0x13   :  { %v75_v18 = vsub.s32 6, %v50_v6  ;;  %v79_v19 = vsub.s32 7, %v50_v6  ;;  %v90_v21 = vsub.s32 %v87_v11, %v50_v6 }
  0x14   :  { %p214_p8 = por %p213_p7, %p212_p6 }
  0x16   :  { %p215_p9 = pnand %p214_p8, %p208_p5 }
  0x17   :  { %v43_v47 = vld [vmem:[#allocation2] sm:$0x1] }
  0x9a   :  { %v47_v20 = vpop.xlane.xlu0 %46 }
  0x9b   :  { %v52_v22 = vrot.slane %v47_v20, %v51_v12  ;;  %v56_v23 = vrot.slane %v47_v20, %v55_v13  ;;  %v60_v24 = vrot.slane %v47_v20, %v59_v14  ;;  %v64_v25 = vrot.slane %v47_v20, %v63_v15 }
  0x9c   :  { %v68_v26 = vrot.slane %v47_v20, %v67_v16  ;;  %v72_v27 = vrot.slane %v47_v20, %v71_v17  ;;  %v76_v28 = vrot.slane %v47_v20, %v75_v18  ;;  %v80_v29 = vrot.slane %v47_v20, %v79_v19 }
  0x9d   :  { %v81_v30 = vcombine.low %v52_v22, %v56_v23  ;;  %v82_v31 = vcombine.low %v60_v24, %v64_v25 }
  0x9e   :  { %v83_v32 = vcombine.low %v68_v26, %v72_v27  ;;  %v84_v33 = vcombine.low %v76_v28, %v80_v29 }
  0x9f   :  { %v91_v34 = vrot.slane %v81_v30, %v90_v21  ;;  %v98_v35 = vrot.slane %v82_v31, %v90_v21 }
  0xa0   :  { %v105_v36 = vrot.slane %v83_v32, %v90_v21  ;;  %v112_v37 = vrot.slane %v84_v33, %v90_v21 }
  0xa1   :  { %v113_v38 = vcombine.low %v91_v34, %v98_v35 }
  0xa2   :  { %v114_v39 = vcombine.low %v105_v36, %v112_v37 }
  0xa3   :  { %v121_v41 = vrot.slane %v113_v38, %v90_v21 }
  0xa4   :  { %v128_v42 = vrot.slane %v114_v39, %v90_v21 }
  0xa6   :  { %v129_v43 = vcombine.low %v121_v41, %v128_v42 }
  0xa8   :  { %131 = vperm.xlu0 %186, %v129_v43  }
 0x123   :  { %v132_v44 = vpop.permute.xlu0 %131 }
 0x124   :  { %v138_v45 = vrot.slane %v132_v44, %v137_v8 }
 0x126   :  { %v145_v46 = vrot.slane %v138_v45, %v90_v21 }
 0x128   :  { %v152_v48 = vrot.slane %v145_v46, %v90_v21 }
 0x12a   :  { %v154_v49 = vadd.f32 %v152_v48, %v43_v47 }
 0x12c   :  { %156 = vst.msk [vmem:[#allocation2] sm:$0x1] %vm32_vm1, %v154_v49 }
 0x133   :  { %v160_v51 = vld [vmem:[#allocation2] sm:$0x1] }
 0x134   :  { %v163_v52 = vadd.f32 %v162_v50, %v160_v51 }
 0x136   :  { %164 = vst.msk [vmem:[#allocation7] sm:$0x1] %vm32_vm1, %v163_v52 }
 0x137   :  { %218 = shalt.err (!%p215_p9)
}
 0x138   :  { %174 = dma.vmem_to_hbm [thread:$0]  %s172_s20, 16, %s274_s3, [#allocation6]  }
 0x139   :  { %229 = dma.done.wait [#allocation6], 16  }
 0x13a   :  { %230 = vsyncadd [#allocation6], 4294967280 }
 0x13b   :  { %178 = vsyncpa [#allocation5], 1 }
 0x13c   :  { %179 = vsyncpa [#allocation6], 1 }

</bundles_post_ra>
